<compile_context>
chip_gen: v7x
topology: tpu7x:2x2x1
jax: 0.10.0
libtpu: 0.0.40
codegen_flags: <defaults>
</compile_context>

<pallas_src>
import functools
import math

import jax
import jax.numpy as jnp
from jax.experimental import pallas as pl
from jax.experimental.pallas import tpu as pltpu


def _round_up(x, m):
    return ((x + m - 1) // m) * m


def _gated_fusion_kernel(*refs, gate_h_cols, has_tab_proj, has_esm_proj):
    it = iter(refs)
    tab_ref = next(it)        # [TN, G*Dt]
    esm_ref = next(it)        # [TN, G*De]
    wa_ref = next(it)         # [G*Dt, G*H (+ G*Do)]  fused gate/proj weight (tab side)
    wb_ref = next(it)         # [G*De, G*H (+ G*Do)]  fused gate/proj weight (esm side)
    b1_ref = next(it)         # [1, G*H]
    w2_ref = next(it)         # [G*H, G*Do]
    b2_ref = next(it)         # [1, G*Do]
    if has_tab_proj:
        bt_ref = next(it)     # [1, G*Do]
    if has_esm_proj:
        be_ref = next(it)     # [1, G*Do]
    out_ref = next(it)        # [TN, G*Do]

    tab = tab_ref[...]
    esm = esm_ref[...]

    # One fused MXU matmul per input: columns [0:G*H) feed the gate MLP,
    # columns [G*H:) (when present) are the linear projection of that input.
    ta = jnp.dot(tab, wa_ref[...], preferred_element_type=jnp.float32)
    tb = jnp.dot(esm, wb_ref[...], preferred_element_type=jnp.float32)

    # Gate MLP: Linear -> ReLU -> Linear -> Sigmoid (f32 VPU/EUP work; the
    # lane slices below are 128-aligned in packed mode -> cheap lane selects).
    h = jnp.maximum(ta[:, :gate_h_cols] + tb[:, :gate_h_cols] + b1_ref[...], 0.0)
    gate = jax.nn.sigmoid(
        jnp.dot(h, w2_ref[...], preferred_element_type=jnp.float32) + b2_ref[...]
    )

    # Projections: identity branches resolved at trace time (no eye() matmul,
    # no extra bias DMA; the packed identity input already matches the
    # packed output layout because that dim equals output_dim).
    if has_tab_proj:
        tab_proj = ta[:, gate_h_cols:] + bt_ref[...]
    else:
        tab_proj = tab.astype(jnp.float32)
    if has_esm_proj:
        esm_proj = tb[:, gate_h_cols:] + be_ref[...]
    else:
        esm_proj = esm.astype(jnp.float32)

    # fused = gate * tp + (1 - gate) * ep  ==  ep + gate * (tp - ep)
    out_ref[...] = (esm_proj + gate * (tab_proj - esm_proj)).astype(out_ref.dtype)


def choose_group_size(tabular_dim, esm_dim, hidden_dim, max_group=16):
    """Samples per packed row so every packed feature width is a multiple of
    128 lanes.  Falls back to 1 (un-packed, lane-sparse) when dims are odd."""
    output_dim = max(tabular_dim, esm_dim)
    g = 1
    for d in (tabular_dim, esm_dim, hidden_dim, output_dim):
        g = math.lcm(g, 128 // math.gcd(128, d))
    return g if g <= max_group else 1


def _block_diag(w, g):
    # kron(eye(g), w): g copies of w on the block diagonal -> [g*in, g*out].
    if g == 1:
        return w
    return jnp.kron(jnp.eye(g, dtype=w.dtype), w)


def pack_gated_fusion_params(params, group):
    """One-time weight transform: block-diagonal (lane-dense) copies of every
    weight plus column-wise fusion of the gate-Linear1 and projection weights
    so the kernel needs a single matmul per input."""
    g = group
    w1t_bd = _block_diag(params["w1t"], g)
    w1e_bd = _block_diag(params["w1e"], g)
    packed = dict(
        b1=jnp.tile(params["b1"], (1, g)),
        w2=_block_diag(params["w2"], g),
        b2=jnp.tile(params["b2"], (1, g)),
    )
    if "wt" in params:
        packed["wa"] = jnp.concatenate([w1t_bd, _block_diag(params["wt"], g)], axis=1)
        packed["bt"] = jnp.tile(params["bt"], (1, g))
    else:
        packed["wa"] = w1t_bd
    if "we" in params:
        packed["wb"] = jnp.concatenate([w1e_bd, _block_diag(params["we"], g)], axis=1)
        packed["be"] = jnp.tile(params["be"], (1, g))
    else:
        packed["wb"] = w1e_bd
    return packed


def gated_fusion_pallas(tab, esm, packed, *, group=1, block_rows=2048):
    """Gated fusion forward pass.

    tab: [N, Dt], esm: [N, De]; `packed` from pack_gated_fusion_params with
    the same `group` (use choose_group_size).  Returns [N, max(Dt, De)] f32.
    """
    n, dt = tab.shape
    n2, de = esm.shape
    assert n == n2
    do = max(dt, de)
    g = group
    has_tab_proj = dt != do
    has_esm_proj = de != do
    gate_cols = packed["b1"].shape[1]          # G * hidden_dim

    # Pad the batch to a multiple of the row group, then view G samples as one
    # lane-dense packed row (layout-preserving for row-major arrays).
    n_pad = _round_up(n, g)
    if n_pad != n:
        tab = jnp.pad(tab, ((0, n_pad - n), (0, 0)))
        esm = jnp.pad(esm, ((0, n_pad - n), (0, 0)))
    rows = n_pad // g
    tab_p = tab.reshape(rows, g * dt)
    esm_p = esm.reshape(rows, g * de)

    # Batch tiling over packed rows.  Keep tiles big (per-step overhead is the
    # dominant cost at ~320 B of HBM traffic per sample), but aim for >=2 grid
    # steps on moderate batches so both TensorCores get work on v7x.
    rows_per_block = max(8, (max(1, block_rows // g) // 8) * 8)
    if rows <= 8:
        tn = rows                                  # single tiny block (full extent)
    else:
        tn = min(rows_per_block, _round_up(pl.cdiv(rows, 2), 8))
    grid = (pl.cdiv(rows, tn),)

    def row_spec(width):
        return pl.BlockSpec((tn, width), lambda i: (i, 0))

    def resident_spec(a):
        # Same block every grid step -> stays VMEM-resident, DMA'd once.
        return pl.BlockSpec(a.shape, lambda i: tuple(0 for _ in a.shape))

    args = [tab_p, esm_p, packed["wa"], packed["wb"], packed["b1"],
            packed["w2"], packed["b2"]]
    if has_tab_proj:
        args.append(packed["bt"])
    if has_esm_proj:
        args.append(packed["be"])

    in_specs = [row_spec(g * dt), row_spec(g * de)] + [
        resident_spec(a) for a in args[2:]
    ]

    kernel = functools.partial(
        _gated_fusion_kernel,
        gate_h_cols=gate_cols,
        has_tab_proj=has_tab_proj,
        has_esm_proj=has_esm_proj,
    )

    # VMEM budget: double-buffered activation/output tiles + resident weights,
    # with headroom; nowhere near binding on v5e/v6e (128 MiB) or v7x (64 MiB).
    act_bytes = 2 * 2 * tn * g * (dt + de + do) * 4
    weight_bytes = sum(int(a.size) * 4 for a in args[2:])
    vmem_limit = int(min(32 * 1024 * 1024,
                         max(8 * 1024 * 1024, 2 * (act_bytes + weight_bytes))))

    out_p = pl.pallas_call(
        kernel,
        out_shape=jax.ShapeDtypeStruct((rows, g * do), jnp.float32),
        grid=grid,
        in_specs=in_specs,
        out_specs=pl.BlockSpec((tn, g * do), lambda i: (i, 0)),
        compiler_params=pltpu.CompilerParams(
            dimension_semantics=("parallel",),   # shards batch across TCs on v7x
            vmem_limit_bytes=vmem_limit,
        ),
    )(*args)

    out = out_p.reshape(n_pad, do)               # zero-cost: identical layout
    return out if n_pad == n else out[:n]


def init_gated_fusion_params(key, tabular_dim, esm_dim, hidden_dim):
    """Deterministic synthetic parameter init matching the module's shapes
    (weights already in [in, out] layout; cat order = tabular rows first)."""
    output_dim = max(tabular_dim, esm_dim)
    keys = jax.random.split(key, 8)

    def lin(kw, kb, fan_in, fan_out):
        bound = 1.0 / (fan_in ** 0.5)
        w = jax.random.uniform(kw, (fan_in, fan_out), jnp.float32, -bound, bound)
        b = jax.random.uniform(kb, (1, fan_out), jnp.float32, -bound, bound)
        return w, b

    w1, b1 = lin(keys[0], keys[1], tabular_dim + esm_dim, hidden_dim)
    w2, b2 = lin(keys[2], keys[3], hidden_dim, output_dim)
    params = dict(w1t=w1[:tabular_dim], w1e=w1[tabular_dim:], b1=b1, w2=w2, b2=b2)

    if tabular_dim != output_dim:
        params["wt"], params["bt"] = lin(keys[4], keys[5], tabular_dim, output_dim)
    if esm_dim != output_dim:
        params["we"], params["be"] = lin(keys[6], keys[7], esm_dim, output_dim)
    return params


def gated_fusion_ref(tab, esm, params):
    """Plain-JAX reference (un-packed weights) for correctness checking."""
    h = jnp.maximum(tab @ params["w1t"] + esm @ params["w1e"] + params["b1"], 0.0)
    gate = jax.nn.sigmoid(h @ params["w2"] + params["b2"])
    tp = tab @ params["wt"] + params["bt"] if "wt" in params else tab
    ep = esm @ params["we"] + params["be"] if "we" in params else esm
    return gate * tp + (1.0 - gate) * ep


if __name__ == "__main__":
    key = jax.random.PRNGKey(0)
    k1, k2, k3, k4, k5, k6, k7 = jax.random.split(key, 7)

    # Small shapes consistent with the module: batch=8, tabular_dim=16,
    # esm_dim=32 -> output_dim=32, hidden_dim=32.  tabular_proj is a real
    # Linear, esm_proj is Identity.  Group size resolves to 8 -> fully
    # lane-dense packed layout (tab [N/8,128], esm/out [N/8,256]).
    N, TAB_DIM, ESM_DIM, HIDDEN = 8, 16, 32, 32
    raw = init_gated_fusion_params(k3, TAB_DIM, ESM_DIM, HIDDEN)
    g = choose_group_size(TAB_DIM, ESM_DIM, HIDDEN)
    packed = pack_gated_fusion_params(raw, g)

    tab = jax.random.normal(k1, (N, TAB_DIM), jnp.float32)
    esm = jax.random.normal(k2, (N, ESM_DIM), jnp.float32)
    out = jax.block_until_ready(gated_fusion_pallas(tab, esm, packed, group=g))
    ref = gated_fusion_ref(tab, esm, raw)
    assert out.shape == (N, max(TAB_DIM, ESM_DIM))
    assert jnp.allclose(out, ref, atol=2e-5, rtol=2e-5), "mismatch (small, packed)"

    # Larger batch, not a multiple of the group: exercises batch padding, a
    # multi-step grid with a ragged final block, and resident weights.
    N2 = 1003
    tab2 = jax.random.normal(k4, (N2, TAB_DIM), jnp.float32)
    esm2 = jax.random.normal(k5, (N2, ESM_DIM), jnp.float32)
    out2 = jax.block_until_ready(
        gated_fusion_pallas(tab2, esm2, packed, group=g, block_rows=256))
    ref2 = gated_fusion_ref(tab2, esm2, raw)
    assert out2.shape == (N2, max(TAB_DIM, ESM_DIM))
    assert jnp.allclose(out2, ref2, atol=2e-5, rtol=2e-5), "mismatch (tiled, packed)"

    # Dims that do not pack cleanly -> group=1 fallback (previous lane-sparse
    # layout), with the esm-side projection active instead of the tabular one.
    DT3, DE3 = 48, 20
    raw3 = init_gated_fusion_params(k6, DT3, DE3, HIDDEN)
    g3 = choose_group_size(DT3, DE3, HIDDEN)
    packed3 = pack_gated_fusion_params(raw3, g3)
    tab3 = jax.random.normal(k7, (10, DT3), jnp.float32)
    esm3 = jax.random.normal(k1, (10, DE3), jnp.float32)
    out3 = jax.block_until_ready(gated_fusion_pallas(tab3, esm3, packed3, group=g3))
    ref3 = gated_fusion_ref(tab3, esm3, raw3)
    assert out3.shape == (10, max(DT3, DE3))
    assert jnp.allclose(out3, ref3, atol=2e-5, rtol=2e-5), "mismatch (fallback)"

    print("KERNEL_OK")
</pallas_src>

<mosaic_0001>
module attributes {stable_mosaic.version = 11 : i64} {
  func.func @_gated_fusion_kernel(%arg0: i32, %arg1: memref<1x128xf32, #tpu.memory_space<vmem>>, %arg2: memref<1x256xf32, #tpu.memory_space<vmem>>, %arg3: memref<128x512xf32, #tpu.memory_space<vmem>>, %arg4: memref<256x256xf32, #tpu.memory_space<vmem>>, %arg5: memref<1x256xf32, #tpu.memory_space<vmem>>, %arg6: memref<256x256xf32, #tpu.memory_space<vmem>>, %arg7: memref<1x256xf32, #tpu.memory_space<vmem>>, %arg8: memref<1x256xf32, #tpu.memory_space<vmem>>, %arg9: memref<1x256xf32, #tpu.memory_space<vmem>>) attributes {dimension_semantics = [#tpu.dimension_semantics<parallel>], iteration_bounds = array<i64: 1>, scalar_prefetch = 0 : i64, scratch_operands = 0 : i64, tpu.core_type = #tpu.core_type<tc>, window_params = [{transform_indices = @transform_0, window_bounds = array<i64: 1, 128>}, {transform_indices = @transform_1, window_bounds = array<i64: 1, 256>}, {pipeline_mode = #tpu.pipeline_mode<synchronous>, transform_indices = @transform_2, window_bounds = array<i64: 128, 512>}, {pipeline_mode = #tpu.pipeline_mode<synchronous>, transform_indices = @transform_3, window_bounds = array<i64: 256, 256>}, {pipeline_mode = #tpu.pipeline_mode<synchronous>, transform_indices = @transform_4, window_bounds = array<i64: 1, 256>}, {pipeline_mode = #tpu.pipeline_mode<synchronous>, transform_indices = @transform_5, window_bounds = array<i64: 256, 256>}, {pipeline_mode = #tpu.pipeline_mode<synchronous>, transform_indices = @transform_6, window_bounds = array<i64: 1, 256>}, {pipeline_mode = #tpu.pipeline_mode<synchronous>, transform_indices = @transform_7, window_bounds = array<i64: 1, 256>}, {transform_indices = @transform_8, window_bounds = array<i64: 1, 256>}]} {
    %c0 = arith.constant 0 : index
    %c0_0 = arith.constant 0 : index
    %0 = vector.load %arg1[%c0, %c0_0] : memref<1x128xf32, #tpu.memory_space<vmem>>, vector<1x128xf32>
    %c0_1 = arith.constant 0 : index
    %c0_2 = arith.constant 0 : index
    %1 = vector.load %arg2[%c0_1, %c0_2] : memref<1x256xf32, #tpu.memory_space<vmem>>, vector<1x256xf32>
    %c0_3 = arith.constant 0 : index
    %c0_4 = arith.constant 0 : index
    %2 = vector.load %arg3[%c0_3, %c0_4] : memref<128x512xf32, #tpu.memory_space<vmem>>, vector<128x512xf32>
    %cst = arith.constant dense<0.000000e+00> : vector<1x512xf32>
    %3 = tpu.matmul %0, %2, %cst {dimension_numbers = #tpu.dot_dimension_numbers<[1], [0], [0], [1], [0, 0, 1, 1], [], []>} : vector<1x128xf32>, vector<128x512xf32>, vector<1x512xf32> -> vector<1x512xf32>
    %c0_5 = arith.constant 0 : index
    %c0_6 = arith.constant 0 : index
    %4 = vector.load %arg4[%c0_5, %c0_6] : memref<256x256xf32, #tpu.memory_space<vmem>>, vector<256x256xf32>
    %cst_7 = arith.constant dense<0.000000e+00> : vector<1x256xf32>
    %5 = tpu.matmul %1, %4, %cst_7 {dimension_numbers = #tpu.dot_dimension_numbers<[1], [0], [0], [1], [0, 0, 1, 1], [], []>} : vector<1x256xf32>, vector<256x256xf32>, vector<1x256xf32> -> vector<1x256xf32>
    %6 = vector.extract_strided_slice %3 {offsets = [0, 0], sizes = [1, 256], strides = [1, 1]} : vector<1x512xf32> to vector<1x256xf32>
    %7 = arith.addf %6, %5 : vector<1x256xf32>
    %c0_8 = arith.constant 0 : index
    %c0_9 = arith.constant 0 : index
    %8 = vector.load %arg5[%c0_8, %c0_9] : memref<1x256xf32, #tpu.memory_space<vmem>>, vector<1x256xf32>
    %9 = arith.addf %7, %8 : vector<1x256xf32>
    %cst_10 = arith.constant 0.000000e+00 : f32
    %10 = vector.broadcast %cst_10 : f32 to vector<1x256xf32>
    %11 = arith.maximumf %9, %10 : vector<1x256xf32>
    %c0_11 = arith.constant 0 : index
    %c0_12 = arith.constant 0 : index
    %12 = vector.load %arg6[%c0_11, %c0_12] : memref<256x256xf32, #tpu.memory_space<vmem>>, vector<256x256xf32>
    %cst_13 = arith.constant dense<0.000000e+00> : vector<1x256xf32>
    %13 = tpu.matmul %11, %12, %cst_13 {dimension_numbers = #tpu.dot_dimension_numbers<[1], [0], [0], [1], [0, 0, 1, 1], [], []>} : vector<1x256xf32>, vector<256x256xf32>, vector<1x256xf32> -> vector<1x256xf32>
    %c0_14 = arith.constant 0 : index
    %c0_15 = arith.constant 0 : index
    %14 = vector.load %arg7[%c0_14, %c0_15] : memref<1x256xf32, #tpu.memory_space<vmem>>, vector<1x256xf32>
    %15 = arith.addf %13, %14 : vector<1x256xf32>
    %16 = arith.negf %15 : vector<1x256xf32>
    %17 = math.exp %16 : vector<1x256xf32>
    %cst_16 = arith.constant 1.000000e+00 : f32
    %18 = vector.broadcast %cst_16 : f32 to vector<1x256xf32>
    %19 = arith.addf %18, %17 : vector<1x256xf32>
    %20 = arith.divf %18, %19 : vector<1x256xf32>
    %21 = vector.extract_strided_slice %3 {offsets = [0, 256], sizes = [1, 256], strides = [1, 1]} : vector<1x512xf32> to vector<1x256xf32>
    %c0_17 = arith.constant 0 : index
    %c0_18 = arith.constant 0 : index
    %22 = vector.load %arg8[%c0_17, %c0_18] : memref<1x256xf32, #tpu.memory_space<vmem>>, vector<1x256xf32>
    %23 = arith.addf %21, %22 : vector<1x256xf32>
    %24 = arith.subf %23, %1 : vector<1x256xf32>
    %25 = arith.mulf %20, %24 : vector<1x256xf32>
    %26 = arith.addf %1, %25 : vector<1x256xf32>
    %c0_19 = arith.constant 0 : index
    %c0_20 = arith.constant 0 : index
    %27 = vector.load %arg9[%c0_19, %c0_20] : memref<1x256xf32, #tpu.memory_space<vmem>>, vector<1x256xf32>
    tpu.vector_store %arg9[%c0_19, %c0_20], %26 {strides = array<i32>} : memref<1x256xf32, #tpu.memory_space<vmem>>, vector<1x256xf32>,
    return
  }
  func.func @transform_0(%arg0: i32) -> (i32, i32) {
    %c0_i32 = arith.constant 0 : i32
    %c0_i32_0 = arith.constant 0 : i32
    return %arg0, %c0_i32 : i32, i32
  }
  func.func @transform_1(%arg0: i32) -> (i32, i32) {
    %c0_i32 = arith.constant 0 : i32
    %c0_i32_0 = arith.constant 0 : i32
    return %arg0, %c0_i32 : i32, i32
  }
  func.func @transform_2(%arg0: i32) -> (i32, i32) {
    %c0_i32 = arith.constant 0 : i32
    %c0_i32_0 = arith.constant 0 : i32
    %c0_i32_1 = arith.constant 0 : i32
    return %c0_i32, %c0_i32_0 : i32, i32
  }
  func.func @transform_3(%arg0: i32) -> (i32, i32) {
    %c0_i32 = arith.constant 0 : i32
    %c0_i32_0 = arith.constant 0 : i32
    %c0_i32_1 = arith.constant 0 : i32
    return %c0_i32, %c0_i32_0 : i32, i32
  }
  func.func @transform_4(%arg0: i32) -> (i32, i32) {
    %c0_i32 = arith.constant 0 : i32
    %c0_i32_0 = arith.constant 0 : i32
    %c0_i32_1 = arith.constant 0 : i32
    return %c0_i32, %c0_i32_0 : i32, i32
  }
  func.func @transform_5(%arg0: i32) -> (i32, i32) {
    %c0_i32 = arith.constant 0 : i32
    %c0_i32_0 = arith.constant 0 : i32
    %c0_i32_1 = arith.constant 0 : i32
    return %c0_i32, %c0_i32_0 : i32, i32
  }
  func.func @transform_6(%arg0: i32) -> (i32, i32) {
    %c0_i32 = arith.constant 0 : i32
    %c0_i32_0 = arith.constant 0 : i32
    %c0_i32_1 = arith.constant 0 : i32
    return %c0_i32, %c0_i32_0 : i32, i32
  }
  func.func @transform_7(%arg0: i32) -> (i32, i32) {
    %c0_i32 = arith.constant 0 : i32
    %c0_i32_0 = arith.constant 0 : i32
    %c0_i32_1 = arith.constant 0 : i32
    return %c0_i32, %c0_i32_0 : i32, i32
  }
  func.func @transform_8(%arg0: i32) -> (i32, i32) {
    %c0_i32 = arith.constant 0 : i32
    %c0_i32_0 = arith.constant 0 : i32
    return %arg0, %c0_i32 : i32, i32
  }
}

</mosaic_0001>

<bundles_post_ra>
// kernel: tpu_custom_call.1
= control target key start
LH: loop header
LB: loop body
LE: loop exit
PB: predicated region body
PF: predicated region fallthrough
CT: control target
= control target key end

     0   :  { %13 = vsyncpa [#allocation3], 0  ;;  %s1170_s0 = inlined_call_operand.hbm [shape: f32[1,128], index: 0, kind: input, shape index: {}]   ;;  %s1171_s1 = inlined_call_operand.vmem [shape: f32[1,256], index: 1, kind: input, shape index: {}]   ;;  %s1172_s2 = inlined_call_operand.hbm [shape: f32[128,512], index: 2, kind: input, shape index: {}]   ;;  %s1173_s3 = inlined_call_operand.hbm [shape: f32[256,256], index: 3, kind: input, shape index: {}]   ;;  %s1174_s4 = inlined_call_operand.vmem [shape: f32[1,256], index: 4, kind: input, shape index: {}]   ;;  %s1175_s5 = inlined_call_operand.hbm [shape: f32[256,256], index: 5, kind: input, shape index: {}]   ;;  %s1176_s6 = inlined_call_operand.vmem [shape: f32[1,256], index: 6, kind: input, shape index: {}]   ;;  %s1177_s7 = inlined_call_operand.vmem [shape: f32[1,256], index: 7, kind: input, shape index: {}]   ;;  %s1178_s8 = inlined_call_operand.hbm [shape: f32[1,256], index: 8, kind: output, shape index: {}]  }
   0x1   :  { %14 = vsyncpa [#allocation6], 0 }
   0x2   :  { %15 = vsyncpa [#allocation9], 0 }
   0x3   :  { %16 = vsyncpa [#allocation4], 0  ;;  %s1006_s27 = smov [#allocation5]   ;;  %s888_s9 = scalar_lea.hbm %s1172_s2, 8192 }
   0x4   :  { %s34_s28 = sshll.u32 %s1006_s27, 4  ;;  %p889_p0 = scmp.ne.s32.totalorder %s1172_s2, %s888_s9  ;;  %s35_s28 = int_to_ptr.vmem [resolvable:$true] %s34_s28 }
   0x5   :  { %p892_p1 = scmp.lt.u32.totalorder %s888_s9, %s1172_s2 }
   0x7   :  { %p894_p2 = pnand %p892_p1, %p889_p0 }
   0x9   :  { %897 = shalt.err (!%p894_p2)
}
   0xa   :  { %s898_s14 = scalar_lea.vmem %s35_s28, 8192  ;;  %p903_p4 = scmp.lt.s32.totalorder %s35_s28, %s35_s28 }
   0xb   :  { %p899_p3 = scmp.ne.s32.totalorder %s35_s28, %s898_s14  ;;  %p904_p5 = scmp.lt.s32.totalorder %s898_s14, %s898_s14 }
   0xd   :  { %p905_p6 = por %p904_p5, %p903_p4 }
   0xf   :  { %p906_p7 = pnand %p905_p6, %p899_p3 }
  0x11   :  { %909 = shalt.err (!%p906_p7)
}
  0x12   :  { %s1007_s15 = smov 512   ;;  %s1008_s16 = smov 32  }
  0x13   :  { %40 = dma.hbm_to_vmem [thread:$0]  %s1172_s2, 8192, %s35_s28, [#allocation6], %s1007_s15, %s1007_s15, %s1008_s16  }
  0x14   :  { %s1009_s19 = smov [#allocation2]   ;;  %s1010_s21 = smov [#allocation7]  }
  0x15   :  { %s23_s20 = sshll.u32 %s1009_s19, 4  ;;  %s46_s22 = sshll.u32 %s1010_s21, 4  ;;  %s24_s20 = int_to_ptr.vmem [resolvable:$true] %s23_s20  ;;  %s47_s22 = int_to_ptr.vmem [resolvable:$true] %s46_s22 }
  0x16   :  { %s910_s25 = scalar_lea.hbm %s1170_s0, 16 }
  0x17   :  { %p911_p8 = scmp.ne.s32.totalorder %s1170_s0, %s910_s25  ;;  %p914_p9 = scmp.lt.u32.totalorder %s910_s25, %s1170_s0 }
  0x19   :  { %p916_p10 = pnand %p914_p9, %p911_p8 }
  0x1b   :  { %919 = shalt.err (!%p916_p10)
}
  0x1c   :  { %s920_s2 = scalar_lea.vmem %s24_s20, 16  ;;  %s924_s28 = scalar_lea.vmem %s24_s20, 32 }
  0x1d   :  { %p921_p11 = scmp.ne.s32.totalorder %s24_s20, %s920_s2  ;;  %p925_p12 = scmp.lt.s32.totalorder %s24_s20, %s24_s20 }
  0x1e   :  { %p926_p13 = scmp.lt.s32.totalorder %s924_s28, %s920_s2 }
  0x20   :  { %p927_p0 = por %p926_p13, %p925_p12 }
  0x22   :  { %p928_p1 = pnand %p927_p0, %p921_p11 }
  0x24   :  { %931 = shalt.err (!%p928_p1)
}
  0x25   :  { %26 = dma.hbm_to_vmem [thread:$0]  %s1170_s0, 16, %s24_s20, [#allocation3]  }
  0x26   :  { %s932_s13 = scalar_lea.hbm %s1173_s3, 8192 }
  0x27   :  { %p933_p2 = scmp.ne.s32.totalorder %s1173_s3, %s932_s13  ;;  %p936_p3 = scmp.lt.u32.totalorder %s932_s13, %s1173_s3 }
  0x29   :  { %p938_p4 = pnand %p936_p3, %p933_p2 }
  0x2b   :  { %941 = shalt.err (!%p938_p4)
}
  0x2c   :  { %s942_s18 = scalar_lea.vmem %s47_s22, 8192  ;;  %p947_p6 = scmp.lt.s32.totalorder %s47_s22, %s47_s22 }
  0x2d   :  { %p943_p5 = scmp.ne.s32.totalorder %s47_s22, %s942_s18  ;;  %p948_p7 = scmp.lt.s32.totalorder %s942_s18, %s942_s18 }
  0x2f   :  { %p949_p8 = por %p948_p7, %p947_p6 }
  0x31   :  { %p950_p9 = pnand %p949_p8, %p943_p5 }
  0x33   :  { %953 = shalt.err (!%p950_p9)
}
  0x34   :  { %s1011_s0 = smov 256   ;;  %s1012_s19 = smov 16  }
  0x35   :  { %52 = dma.hbm_to_vmem [thread:$0]  %s1173_s3, 8192, %s47_s22, [#allocation6], %s1011_s0, %s1011_s0, %s1012_s19  }
  0x36   :  { %s1013_s23 = smov [#allocation8]   ;;  %s954_s27 = scalar_lea.hbm %s1175_s5, 8192 }
  0x37   :  { %s60_s24 = sshll.u32 %s1013_s23, 4  ;;  %p955_p10 = scmp.ne.s32.totalorder %s1175_s5, %s954_s27  ;;  %s61_s24 = int_to_ptr.vmem [resolvable:$true] %s60_s24 }
  0x38   :  { %p958_p11 = scmp.lt.u32.totalorder %s954_s27, %s1175_s5 }
  0x3a   :  { %p960_p12 = pnand %p958_p11, %p955_p10 }
  0x3c   :  { %963 = shalt.err (!%p960_p12)
}
  0x3d   :  { %s964_s9 = scalar_lea.vmem %s61_s24, 8192  ;;  %p969_p0 = scmp.lt.s32.totalorder %s61_s24, %s61_s24 }
  0x3e   :  { %p965_p13 = scmp.ne.s32.totalorder %s61_s24, %s964_s9  ;;  %p970_p1 = scmp.lt.s32.totalorder %s964_s9, %s964_s9 }
  0x40   :  { %p971_p2 = por %p970_p1, %p969_p0 }
  0x42   :  { %p972_p3 = pnand %p971_p2, %p965_p13 }
  0x44   :  { %975 = shalt.err (!%p972_p3)
}
  0x45   :  { %66 = dma.hbm_to_vmem [thread:$0]  %s1175_s5, 8192, %s61_s24, [#allocation9], %s1011_s0, %s1011_s0, %s1012_s19  }
  0x46   :  { %998 = dma.done.wait [#allocation3], 16  }
  0x47   :  { %999 = vsyncadd [#allocation3], 4294967280 }
  0x48   :  { %1000 = dma.done.wait [#allocation6], 16384  }
  0x49   :  { %1001 = vsyncadd [#allocation6], 4294950912 }
  0x4a   :  { %1002 = dma.done.wait [#allocation9], 8192  }
  0x4b   :  { %1003 = vsyncadd [#allocation9], 4294959104  ;;  %v1014_v0 = vmov 0.0   ;;  %v86_v1 = vld [vmem:[#allocation5 + $0x8] sm:$0xff]  ;;  %v85_v3 = vld [vmem:[#allocation5] sm:$0xff]  ;;  %v356_v42 = vlaneseq }
  0x4c   :  { %213 = vmatprep.mubr.f32.mxu0 %v1014_v0  ;;  %284 = vmatprep.mubr.f32.mxu1 %v1014_v0  ;;  %v90_v2 = vld [vmem:[#allocation5 + $0x28] sm:$0xff]  ;;  %v89_v5 = vld [vmem:[#allocation5 + $0x20] sm:$0xff]  ;;  %v294_v51 = vld [vmem:[#allocation7 + $0x18] sm:$0xff] }
  0x4d   :  { %v675_v4 = vpack.c.bf16 %v90_v2, %v86_v1  ;;  %v94_v6 = vld [vmem:[#allocation5 + $0x48] sm:$0xff]  ;;  %v677_v8 = vpack.c.bf16 %v89_v5, %v85_v3  ;;  %v93_v10 = vld [vmem:[#allocation5 + $0x40] sm:$0xff]  ;;  %v1111_v49 = vshrl.u32 %v356_v42, 7  ;;  %v293_v55 = vld [vmem:[#allocation7 + $0x10] sm:$0xff]  ;;  %vm653_vm0 = vcmp.lt.s32.totalorder %v356_v42, 256 }
  0x4e   :  { %v98_v7 = vld [vmem:[#allocation5 + $0x68] sm:$0xff]  ;;  %v97_v11 = vld [vmem:[#allocation5 + $0x60] sm:$0xff]  ;;  %v298_v58 = vld [vmem:[#allocation7 + $0x38] sm:$0xff] }
  0x4f   :  { %v679_v9 = vpack.c.bf16 %v98_v7, %v94_v6  ;;  %v102_v12 = vld [vmem:[#allocation5 + $0x88] sm:$0xff]  ;;  %676 = vmatprep.subr.bf16.mxu0 %v675_v4  ;;  %v681_v14 = vpack.c.bf16 %v97_v11, %v93_v10  ;;  %v101_v16 = vld [vmem:[#allocation5 + $0x80] sm:$0xff]  ;;  %v1114_v56 = vsub.s32 1, %v1111_v49  ;;  %v1116_v59 = vld [vmem:[#allocation2] sm:$0x1] }
  0x50   :  { %v106_v13 = vld [vmem:[#allocation5 + $0xa8] sm:$0xff]  ;;  %678 = vmatpush1.bf16.msra.mxu0 %v677_v8  ;;  %v105_v17 = vld [vmem:[#allocation5 + $0xa0] sm:$0xff]  ;;  %v297_v61 = vld [vmem:[#allocation7 + $0x30] sm:$0xff] }
  0x51   :  { %680 = vmatprep.subr.bf16.mxu0 %v679_v9  ;;  %v683_v15 = vpack.c.bf16 %v106_v13, %v102_v12  ;;  %v110_v18 = vld [vmem:[#allocation5 + $0xc8] sm:$0xff]  ;;  %v685_v20 = vpack.c.bf16 %v105_v17, %v101_v16  ;;  %v109_v22 = vld [vmem:[#allocation5 + $0xc0] sm:$0xff]  ;;  %v1121_v0 = vld [vmem:[%s1171_s1] sm:$0x3] }
  0x52   :  { %v114_v19 = vld [vmem:[#allocation5 + $0xe8] sm:$0xff]  ;;  %v113_v23 = vld [vmem:[#allocation5 + $0xe0] sm:$0xff]  ;;  %v88_v1 = vld [vmem:[#allocation5 + $0x18] sm:$0xff]  ;;  %v1125_v3 = vrot.slane %v1121_v0, %v1114_v56 }
  0x53   :  { %v687_v21 = vpack.c.bf16 %v114_v19, %v110_v18  ;;  %v118_v24 = vld [vmem:[#allocation5 + $0x108] sm:$0xff]  ;;  %v689_v26 = vpack.c.bf16 %v113_v23, %v109_v22  ;;  %v117_v28 = vld [vmem:[#allocation5 + $0x100] sm:$0xff]  ;;  %v92_v4 = vld [vmem:[#allocation5 + $0x38] sm:$0xff] }
  0x54   :  { %682 = vmatpush1.bf16.msra.mxu0 %v681_v14  ;;  %v122_v25 = vld [vmem:[#allocation5 + $0x128] sm:$0xff]  ;;  %v121_v29 = vld [vmem:[#allocation5 + $0x120] sm:$0xff]  ;;  %v87_v5 = vld [vmem:[#allocation5 + $0x10] sm:$0xff]  ;;  %v707_v8 = vpack.c.bf16 %v92_v4, %v88_v1 }
  0x55   :  { %684 = vmatprep.subr.bf16.mxu0 %v683_v15  ;;  %v691_v27 = vpack.c.bf16 %v122_v25, %v118_v24  ;;  %v126_v30 = vld [vmem:[#allocation5 + $0x148] sm:$0xff]  ;;  %v693_v32 = vpack.c.bf16 %v121_v29, %v117_v28  ;;  %v125_v34 = vld [vmem:[#allocation5 + $0x140] sm:$0xff]  ;;  %v91_v6 = vld [vmem:[#allocation5 + $0x30] sm:$0xff] }
  0x56   :  { %v130_v31 = vld [vmem:[#allocation5 + $0x168] sm:$0xff]  ;;  %v129_v35 = vld [vmem:[#allocation5 + $0x160] sm:$0xff]  ;;  %v302_v7 = vld [vmem:[#allocation7 + $0x58] sm:$0xff]  ;;  %v709_v9 = vpack.c.bf16 %v91_v6, %v87_v5  ;;  %708 = vmatprep.subr.bf16.mxu1 %v707_v8 }
  0x57   :  { %v695_v33 = vpack.c.bf16 %v130_v31, %v126_v30  ;;  %v134_v36 = vld [vmem:[#allocation5 + $0x188] sm:$0xff]  ;;  %v697_v38 = vpack.c.bf16 %v129_v35, %v125_v34  ;;  %v133_v40 = vld [vmem:[#allocation5 + $0x180] sm:$0xff]  ;;  %v96_v10 = vld [vmem:[#allocation5 + $0x58] sm:$0xff] }
  0x58   :  { %686 = vmatpush1.bf16.msra.mxu0 %v685_v20  ;;  %v138_v37 = vld [vmem:[#allocation5 + $0x1a8] sm:$0xff]  ;;  %v137_v41 = vld [vmem:[#allocation5 + $0x1a0] sm:$0xff]  ;;  %v100_v11 = vld [vmem:[#allocation5 + $0x78] sm:$0xff]  ;;  %710 = vmatpush1.bf16.msra.mxu1 %v709_v9 }
  0x59   :  { %688 = vmatprep.subr.bf16.mxu0 %v687_v21  ;;  %v699_v39 = vpack.c.bf16 %v138_v37, %v134_v36  ;;  %v142_v43 = vld [vmem:[#allocation5 + $0x1c8] sm:$0xff]  ;;  %v701_v45 = vpack.c.bf16 %v137_v41, %v133_v40  ;;  %v141_v47 = vld [vmem:[#allocation5 + $0x1c0] sm:$0xff]  ;;  %v711_v12 = vpack.c.bf16 %v100_v11, %v96_v10  ;;  %v95_v13 = vld [vmem:[#allocation5 + $0x50] sm:$0xff] }
  0x5a   :  { %v146_v44 = vld [vmem:[#allocation5 + $0x1e8] sm:$0xff]  ;;  %v145_v48 = vld [vmem:[#allocation5 + $0x1e0] sm:$0xff]  ;;  %v99_v14 = vld [vmem:[#allocation5 + $0x70] sm:$0xff] }
  0x5b   :  { %v703_v46 = vpack.c.bf16 %v146_v44, %v142_v43  ;;  %v292_v50 = vld [vmem:[#allocation7 + $0x8] sm:$0xff]  ;;  %v705_v52 = vpack.c.bf16 %v145_v48, %v141_v47  ;;  %v291_v54 = vld [vmem:[#allocation7] sm:$0xff]  ;;  %v104_v16 = vld [vmem:[#allocation5 + $0x98] sm:$0xff]  ;;  %v713_v23 = vpack.c.bf16 %v99_v14, %v95_v13  ;;  %712 = vmatprep.subr.bf16.mxu1 %v711_v12 }
  0x5c   :  { %690 = vmatpush1.bf16.msra.mxu0 %v689_v26  ;;  %v739_v53 = vpack.c.bf16 %v294_v51, %v292_v50  ;;  %v296_v57 = vld [vmem:[#allocation7 + $0x28] sm:$0xff]  ;;  %v295_v60 = vld [vmem:[#allocation7 + $0x20] sm:$0xff]  ;;  %v741_v62 = vpack.c.bf16 %v293_v55, %v291_v54  ;;  %v108_v17 = vld [vmem:[#allocation5 + $0xb8] sm:$0xff] }
  0x5d   :  { %692 = vmatprep.subr.bf16.mxu0 %v691_v27  ;;  %v300_v63 = vld [vmem:[#allocation7 + $0x48] sm:$0xff]  ;;  %v743_v2 = vpack.c.bf16 %v298_v58, %v296_v57  ;;  %v745_v15 = vpack.c.bf16 %v297_v61, %v295_v60  ;;  %v299_v19 = vld [vmem:[#allocation7 + $0x40] sm:$0xff]  ;;  %v301_v20 = vld [vmem:[#allocation7 + $0x50] sm:$0xff]  ;;  %v715_v24 = vpack.c.bf16 %v108_v17, %v104_v16  ;;  %714 = vmatpush1.bf16.msra.mxu1 %v713_v23 }
  0x5e   :  { %v747_v18 = vpack.c.bf16 %v302_v7, %v300_v63  ;;  %v304_v21 = vld [vmem:[#allocation7 + $0x68] sm:$0xff]  ;;  %v306_v22 = vld [vmem:[#allocation7 + $0x78] sm:$0xff]  ;;  %v103_v25 = vld [vmem:[#allocation5 + $0x90] sm:$0xff]  ;;  %v749_v27 = vpack.c.bf16 %v301_v20, %v299_v19 }
  0x5f   :  { %v107_v26 = vld [vmem:[#allocation5 + $0xb0] sm:$0xff]  ;;  %v112_v28 = vld [vmem:[#allocation5 + $0xd8] sm:$0xff]  ;;  %v751_v30 = vpack.c.bf16 %v306_v22, %v304_v21  ;;  %v303_v31 = vld [vmem:[#allocation7 + $0x60] sm:$0xff]  ;;  %716 = vmatprep.subr.bf16.mxu1 %v715_v24 }
  0x60   :  { %694 = vmatpush1.bf16.msra.mxu0 %v693_v32  ;;  %v116_v29 = vld [vmem:[#allocation5 + $0xf8] sm:$0xff]  ;;  %v305_v32 = vld [vmem:[#allocation7 + $0x70] sm:$0xff]  ;;  %v717_v35 = vpack.c.bf16 %v107_v26, %v103_v25  ;;  %v307_v44 = vld [vmem:[#allocation7 + $0x80] sm:$0xff] }
  0x61   :  { %696 = vmatprep.subr.bf16.mxu0 %v695_v33  ;;  %v308_v33 = vld [vmem:[#allocation7 + $0x88] sm:$0xff]  ;;  %v310_v34 = vld [vmem:[#allocation7 + $0x98] sm:$0xff]  ;;  %v719_v36 = vpack.c.bf16 %v116_v29, %v112_v28  ;;  %v111_v37 = vld [vmem:[#allocation5 + $0xd0] sm:$0xff] }
  0x62   :  { %v120_v40 = vld [vmem:[#allocation5 + $0x118] sm:$0xff]  ;;  %v755_v43 = vpack.c.bf16 %v310_v34, %v308_v33  ;;  %718 = vmatpush1.bf16.msra.mxu1 %v717_v35  ;;  %v119_v51 = vld [vmem:[#allocation5 + $0x110] sm:$0xff]  ;;  %v311_v58 = vld [vmem:[#allocation7 + $0xa0] sm:$0xff] }
  0x63   :  { %v124_v41 = vld [vmem:[#allocation5 + $0x138] sm:$0xff]  ;;  %720 = vmatprep.subr.bf16.mxu1 %v719_v36  ;;  %v313_v60 = vld [vmem:[#allocation7 + $0xb0] sm:$0xff]  ;;  %v316_v61 = vld [vmem:[#allocation7 + $0xc8] sm:$0xff] }
  0x64   :  { %698 = vmatpush1.bf16.msra.mxu0 %v697_v38  ;;  %v115_v38 = vld [vmem:[#allocation5 + $0xf0] sm:$0xff]  ;;  %v314_v47 = vld [vmem:[#allocation7 + $0xb8] sm:$0xff]  ;;  %v723_v50 = vpack.c.bf16 %v124_v41, %v120_v40  ;;  %v761_v5 = vpack.c.bf16 %v313_v60, %v311_v58  ;;  %v315_v9 = vld [vmem:[#allocation7 + $0xc0] sm:$0xff] }
  0x65   :  { %700 = vmatprep.subr.bf16.mxu0 %v699_v39  ;;  %v753_v39 = vpack.c.bf16 %v305_v32, %v303_v31  ;;  %v721_v48 = vpack.c.bf16 %v115_v38, %v111_v37  ;;  %v128_v54 = vld [vmem:[#allocation5 + $0x158] sm:$0xff]  ;;  %v131_v4 = vld [vmem:[#allocation5 + $0x170] sm:$0xff]  ;;  %v320_v11 = vld [vmem:[#allocation7 + $0xe8] sm:$0xff] }
  0x66   :  { %v132_v55 = vld [vmem:[#allocation5 + $0x178] sm:$0xff]  ;;  %v317_v10 = vld [vmem:[#allocation7 + $0xd0] sm:$0xff]  ;;  %v319_v21 = vld [vmem:[#allocation7 + $0xe0] sm:$0xff] }
  0x67   :  { %722 = vmatpush1.bf16.msra.mxu1 %v721_v48  ;;  %v727_v1 = vpack.c.bf16 %v132_v55, %v128_v54  ;;  %v136_v6 = vld [vmem:[#allocation5 + $0x198] sm:$0xff]  ;;  %v139_v16 = vld [vmem:[#allocation5 + $0x1b0] sm:$0xff]  ;;  %v765_v17 = vpack.c.bf16 %v317_v10, %v315_v9  ;;  %v324_v23 = vld [vmem:[#allocation7 + $0x108] sm:$0xff] }
  0x68   :  { %702 = vmatpush1.bf16.msra.mxu0 %v701_v45  ;;  %v309_v45 = vld [vmem:[#allocation7 + $0x90] sm:$0xff]  ;;  %724 = vmatprep.subr.bf16.mxu1 %v723_v50  ;;  %v140_v7 = vld [vmem:[#allocation5 + $0x1b8] sm:$0xff]  ;;  %v323_v33 = vld [vmem:[#allocation7 + $0x100] sm:$0xff] }
  0x69   :  { %704 = vmatprep.subr.bf16.mxu0 %v703_v46  ;;  %v312_v46 = vld [vmem:[#allocation7 + $0xa8] sm:$0xff]  ;;  %v322_v12 = vld [vmem:[#allocation7 + $0xf8] sm:$0xff]  ;;  %v731_v14 = vpack.c.bf16 %v140_v7, %v136_v6  ;;  %v321_v22 = vld [vmem:[#allocation7 + $0xf0] sm:$0xff] }
  0x6a   :  { %v759_v57 = vpack.c.bf16 %v314_v47, %v312_v46  ;;  %v148_v19 = vld [vmem:[#allocation5 + $0x1f8] sm:$0xff]  ;;  %v767_v20 = vpack.c.bf16 %v322_v12, %v320_v11  ;;  %v147_v28 = vld [vmem:[#allocation5 + $0x1f0] sm:$0xff]  ;;  %v769_v29 = vpack.c.bf16 %v321_v22, %v319_v21  ;;  %v328_v35 = vld [vmem:[#allocation7 + $0x128] sm:$0xff] }
  0x6b   :  { %v326_v24 = vld [vmem:[#allocation7 + $0x118] sm:$0xff]  ;;  %v325_v34 = vld [vmem:[#allocation7 + $0x110] sm:$0xff]  ;;  %v327_v46 = vld [vmem:[#allocation7 + $0x120] sm:$0xff] }
  0x6c   :  { %706 = vmatpush1.bf16.msra.mxu0 %v705_v52  ;;  %v123_v52 = vld [vmem:[#allocation5 + $0x130] sm:$0xff]  ;;  %v458_v31 = vld [vmem:[#allocation8 + $0x18] sm:$0xff]  ;;  %v771_v32 = vpack.c.bf16 %v326_v24, %v324_v23  ;;  %v773_v41 = vpack.c.bf16 %v325_v34, %v323_v33  ;;  %v332_v48 = vld [vmem:[#allocation7 + $0x148] sm:$0xff] }
  0x6d   :  { %740 = vmatprep.subr.bf16.mxu0 %v739_v53  ;;  %v757_v53 = vpack.c.bf16 %v309_v45, %v307_v44  ;;  %v725_v63 = vpack.c.bf16 %v123_v52, %v119_v51  ;;  %v330_v36 = vld [vmem:[#allocation7 + $0x138] sm:$0xff]  ;;  %v457_v40 = vld [vmem:[#allocation8 + $0x10] sm:$0xff]  ;;  %v335_v11 = vld [vmem:[#allocation7 + $0x160] sm:$0xff] }
  0x6e   :  { %v462_v44 = vld [vmem:[#allocation8 + $0x38] sm:$0xff]  ;;  %v775_v45 = vpack.c.bf16 %v330_v36, %v328_v35  ;;  %v329_v47 = vld [vmem:[#allocation7 + $0x130] sm:$0xff]  ;;  %v339_v22 = vld [vmem:[#allocation7 + $0x180] sm:$0xff] }
  0x6f   :  { %214 = vmatmul.mubr.f32.vlgmr.msra.gmra.mrb[0].mxu0 %v1116_v59  ;;  %726 = vmatpush1.bf16.msra.mxu1 %v725_v63  ;;  %v334_v50 = vld [vmem:[#allocation7 + $0x158] sm:$0xff]  ;;  %v461_v54 = vld [vmem:[#allocation8 + $0x30] sm:$0xff]  ;;  %v777_v55 = vpack.c.bf16 %v329_v47, %v327_v46  ;;  %v336_v63 = vld [vmem:[#allocation7 + $0x168] sm:$0xff] }
  0x70   :  { %742 = vmatpush1.bf16.msra.mxu0 %v741_v62  ;;  %430 = vmatprep.mubr.f32.mxu0 %v1125_v3  ;;  %v318_v62 = vld [vmem:[#allocation7 + $0xd8] sm:$0xff]  ;;  %v779_v60 = vpack.c.bf16 %v334_v50, %v332_v48  ;;  %v465_v6 = vld [vmem:[#allocation8 + $0x50] sm:$0xff]  ;;  %v344_v24 = vld [vmem:[#allocation7 + $0x1a8] sm:$0xff] }
  0x71   :  { %744 = vmatprep.subr.bf16.mxu0 %v743_v2  ;;  %v127_v2 = vld [vmem:[#allocation5 + $0x150] sm:$0xff]  ;;  %v763_v8 = vpack.c.bf16 %v318_v62, %v316_v61  ;;  %728 = vmatprep.subr.bf16.mxu1 %v727_v1  ;;  %v466_v58 = vld [vmem:[#allocation8 + $0x58] sm:$0xff]  ;;  %v331_v61 = vld [vmem:[#allocation7 + $0x140] sm:$0xff] }
  0x72   :  { %v729_v13 = vpack.c.bf16 %v131_v4, %v127_v2  ;;  %v333_v62 = vld [vmem:[#allocation7 + $0x150] sm:$0xff]  ;;  %v338_v1 = vld [vmem:[#allocation7 + $0x178] sm:$0xff]  ;;  %v343_v34 = vld [vmem:[#allocation7 + $0x1a0] sm:$0xff] }
  0x73   :  { %v781_v7 = vpack.c.bf16 %v333_v62, %v331_v61  ;;  %v470_v9 = vld [vmem:[#allocation8 + $0x78] sm:$0xff]  ;;  %v783_v10 = vpack.c.bf16 %v338_v1, %v336_v63  ;;  %v337_v12 = vld [vmem:[#allocation7 + $0x170] sm:$0xff]  ;;  %v348_v36 = vld [vmem:[#allocation7 + $0x1c8] sm:$0xff] }
  0x74   :  { %746 = vmatpush1.bf16.msra.mxu0 %v745_v15  ;;  %v135_v15 = vld [vmem:[#allocation5 + $0x190] sm:$0xff]  ;;  %730 = vmatpush1.bf16.msra.mxu1 %v729_v13  ;;  %v340_v13 = vld [vmem:[#allocation7 + $0x188] sm:$0xff]  ;;  %v347_v47 = vld [vmem:[#allocation7 + $0x1c0] sm:$0xff] }
  0x75   :  { %748 = vmatprep.subr.bf16.mxu0 %v747_v18  ;;  %v144_v18 = vld [vmem:[#allocation5 + $0x1d8] sm:$0xff]  ;;  %v733_v25 = vpack.c.bf16 %v139_v16, %v135_v15  ;;  %732 = vmatprep.subr.bf16.mxu1 %v731_v14  ;;  %v467_v16 = vld [vmem:[#allocation8 + $0x60] sm:$0xff]  ;;  %v341_v23 = vld [vmem:[#allocation7 + $0x190] sm:$0xff] }
  0x76   :  { %v735_v26 = vpack.c.bf16 %v148_v19, %v144_v18  ;;  %v342_v14 = vld [vmem:[#allocation7 + $0x198] sm:$0xff]  ;;  %v785_v18 = vpack.c.bf16 %v337_v12, %v335_v11  ;;  %v472_v19 = vld [vmem:[#allocation8 + $0x88] sm:$0xff]  ;;  %v345_v35 = vld [vmem:[#allocation7 + $0x1b0] sm:$0xff] }
  0x77   :  { %v787_v21 = vpack.c.bf16 %v342_v14, %v340_v13  ;;  %v349_v48 = vld [vmem:[#allocation7 + $0x1d0] sm:$0xff]  ;;  %v352_v50 = vld [vmem:[#allocation7 + $0x1e8] sm:$0xff]  ;;  %v351_v62 = vld [vmem:[#allocation7 + $0x1e0] sm:$0xff] }
  0x78   :  { %750 = vmatpush1.bf16.msra.mxu0 %v749_v27  ;;  %v143_v27 = vld [vmem:[#allocation5 + $0x1d0] sm:$0xff]  ;;  %734 = vmatpush1.bf16.msra.mxu1 %v733_v25  ;;  %v346_v25 = vld [vmem:[#allocation7 + $0x1b8] sm:$0xff]  ;;  %v487_v13 = vld [vmem:[#allocation8 + $0x100] sm:$0xff] }
  0x79   :  { %752 = vmatprep.subr.bf16.mxu0 %v751_v30  ;;  %v456_v30 = vld [vmem:[#allocation8 + $0x8] sm:$0xff]  ;;  %v737_v37 = vpack.c.bf16 %v147_v28, %v143_v27  ;;  %736 = vmatprep.subr.bf16.mxu1 %v735_v26  ;;  %v471_v28 = vld [vmem:[#allocation8 + $0x80] sm:$0xff]  ;;  %v791_v33 = vpack.c.bf16 %v346_v25, %v344_v24  ;;  %v353_v63 = vld [vmem:[#allocation7 + $0x1f0] sm:$0xff] }
  0x7a   :  { %v803_v38 = vpack.c.bf16 %v458_v31, %v456_v30  ;;  %v789_v30 = vpack.c.bf16 %v341_v23, %v339_v22  ;;  %v476_v31 = vld [vmem:[#allocation8 + $0xa8] sm:$0xff]  ;;  %v489_v14 = vld [vmem:[#allocation8 + $0x110] sm:$0xff]  ;;  %v495_v24 = vld [vmem:[#allocation8 + $0x140] sm:$0xff] }
  0x7b   :  { %v497_v25 = vld [vmem:[#allocation8 + $0x150] sm:$0xff] }
  0x7c   :  { %754 = vmatpush1.bf16.msra.mxu0 %v753_v39  ;;  %v455_v39 = vld [vmem:[#allocation8] sm:$0xff]  ;;  %738 = vmatpush1.bf16.msra.mxu1 %v737_v37  ;;  %v350_v37 = vld [vmem:[#allocation7 + $0x1d8] sm:$0xff] }
  0x7d   :  { %756 = vmatprep.subr.bf16.mxu0 %v755_v43  ;;  %v460_v43 = vld [vmem:[#allocation8 + $0x28] sm:$0xff]  ;;  %v805_v51 = vpack.c.bf16 %v457_v40, %v455_v39  ;;  %804 = vmatprep.subr.bf16.mxu1 %v803_v38  ;;  %v475_v40 = vld [vmem:[#allocation8 + $0xa0] sm:$0xff]  ;;  %v795_v46 = vpack.c.bf16 %v350_v37, %v348_v36  ;;  %v505_v37 = vld [vmem:[#allocation8 + $0x190] sm:$0xff] }
  0x7e   :  { %v807_v52 = vpack.c.bf16 %v462_v44, %v460_v43  ;;  %v793_v43 = vpack.c.bf16 %v345_v35, %v343_v34  ;;  %v480_v44 = vld [vmem:[#allocation8 + $0xc8] sm:$0xff]  ;;  %v503_v36 = vld [vmem:[#allocation8 + $0x180] sm:$0xff] }
  0x7f   :  { %285 = vmatmul.mubr.f32.vlgmr.msra.gmra.mrb[0].mxu1 %v1116_v59 }
  0x80   :  { %758 = vmatpush1.bf16.msra.mxu0 %v757_v53  ;;  %v459_v53 = vld [vmem:[#allocation8 + $0x20] sm:$0xff]  ;;  %806 = vmatpush1.bf16.msra.mxu1 %v805_v51  ;;  %v354_v51 = vld [vmem:[#allocation7 + $0x1f8] sm:$0xff] }
  0x81   :  { %760 = vmatprep.subr.bf16.mxu0 %v759_v57  ;;  %v464_v57 = vld [vmem:[#allocation8 + $0x48] sm:$0xff]  ;;  %v809_v2 = vpack.c.bf16 %v461_v54, %v459_v53  ;;  %808 = vmatprep.subr.bf16.mxu1 %v807_v52  ;;  %v479_v54 = vld [vmem:[#allocation8 + $0xc0] sm:$0xff]  ;;  %v799_v61 = vpack.c.bf16 %v354_v51, %v352_v50  ;;  %v513_v51 = vld [vmem:[#allocation8 + $0x1d0] sm:$0xff] }
  0x82   :  { %v811_v4 = vpack.c.bf16 %v466_v58, %v464_v57  ;;  %v797_v57 = vpack.c.bf16 %v349_v48, %v347_v47  ;;  %v484_v58 = vld [vmem:[#allocation8 + $0xe8] sm:$0xff]  ;;  %v511_v50 = vld [vmem:[#allocation8 + $0x1c0] sm:$0xff] }
  0x84   :  { %762 = vmatpush1.bf16.msra.mxu0 %v761_v5  ;;  %v463_v5 = vld [vmem:[#allocation8 + $0x40] sm:$0xff]  ;;  %810 = vmatpush1.bf16.msra.mxu1 %v809_v2  ;;  %v1131_v2 = vsub.s32 0, %v1111_v49 }
  0x85   :  { %764 = vmatprep.subr.bf16.mxu0 %v763_v8  ;;  %v468_v8 = vld [vmem:[#allocation8 + $0x68] sm:$0xff]  ;;  %v813_v59 = vpack.c.bf16 %v465_v6, %v463_v5  ;;  %812 = vmatprep.subr.bf16.mxu1 %v811_v4  ;;  %v483_v5 = vld [vmem:[#allocation8 + $0xe0] sm:$0xff]  ;;  %v485_v6 = vld [vmem:[#allocation8 + $0xf0] sm:$0xff] }
  0x86   :  { %v815_v15 = vpack.c.bf16 %v470_v9, %v468_v8  ;;  %v488_v8 = vld [vmem:[#allocation8 + $0x108] sm:$0xff]  ;;  %v490_v9 = vld [vmem:[#allocation8 + $0x118] sm:$0xff]  ;;  %v1135_v11 = vrot.slane %v1121_v0, %v1131_v2 }
  0x87   :  { %v835_v12 = vpack.c.bf16 %v490_v9, %v488_v8 }
  0x88   :  { %766 = vmatpush1.bf16.msra.mxu0 %v765_v17  ;;  %v469_v17 = vld [vmem:[#allocation8 + $0x70] sm:$0xff]  ;;  %814 = vmatpush1.bf16.msra.mxu1 %v813_v59  ;;  %v492_v59 = vld [vmem:[#allocation8 + $0x128] sm:$0xff] }
  0x89   :  { %768 = vmatprep.subr.bf16.mxu0 %v767_v20  ;;  %v474_v20 = vld [vmem:[#allocation8 + $0x98] sm:$0xff]  ;;  %v817_v26 = vpack.c.bf16 %v469_v17, %v467_v16  ;;  %816 = vmatprep.subr.bf16.mxu1 %v815_v15  ;;  %v837_v16 = vpack.c.bf16 %v489_v14, %v487_v13 }
  0x8a   :  { %v819_v27 = vpack.c.bf16 %v474_v20, %v472_v19  ;;  %v494_v15 = vld [vmem:[#allocation8 + $0x138] sm:$0xff]  ;;  %v493_v19 = vld [vmem:[#allocation8 + $0x130] sm:$0xff]  ;;  %v496_v20 = vld [vmem:[#allocation8 + $0x148] sm:$0xff] }
  0x8b   :  { %v839_v17 = vpack.c.bf16 %v494_v15, %v492_v59 }
  0x8c   :  { %770 = vmatpush1.bf16.msra.mxu0 %v769_v29  ;;  %v473_v29 = vld [vmem:[#allocation8 + $0x90] sm:$0xff]  ;;  %818 = vmatpush1.bf16.msra.mxu1 %v817_v26  ;;  %v500_v26 = vld [vmem:[#allocation8 + $0x168] sm:$0xff] }
  0x8d   :  { %772 = vmatprep.subr.bf16.mxu0 %v771_v32  ;;  %v478_v32 = vld [vmem:[#allocation8 + $0xb8] sm:$0xff]  ;;  %v821_v38 = vpack.c.bf16 %v473_v29, %v471_v28  ;;  %820 = vmatprep.subr.bf16.mxu1 %v819_v27  ;;  %v845_v28 = vpack.c.bf16 %v497_v25, %v495_v24 }
  0x8e   :  { %v823_v39 = vpack.c.bf16 %v478_v32, %v476_v31  ;;  %v502_v27 = vld [vmem:[#allocation8 + $0x178] sm:$0xff]  ;;  %v501_v31 = vld [vmem:[#allocation8 + $0x170] sm:$0xff]  ;;  %v504_v32 = vld [vmem:[#allocation8 + $0x188] sm:$0xff] }
  0x8f   :  { %v847_v29 = vpack.c.bf16 %v502_v27, %v500_v26  ;;  %v1015_v27 = vmov 1966171168  }
  0x90   :  { %774 = vmatpush1.bf16.msra.mxu0 %v773_v41  ;;  %v477_v41 = vld [vmem:[#allocation8 + $0xb0] sm:$0xff]  ;;  %822 = vmatpush1.bf16.msra.mxu1 %v821_v38  ;;  %v508_v38 = vld [vmem:[#allocation8 + $0x1a8] sm:$0xff] }
  0x91   :  { %776 = vmatprep.subr.bf16.mxu0 %v775_v45  ;;  %v482_v45 = vld [vmem:[#allocation8 + $0xd8] sm:$0xff]  ;;  %v825_v52 = vpack.c.bf16 %v477_v41, %v475_v40  ;;  %824 = vmatprep.subr.bf16.mxu1 %v823_v39  ;;  %v853_v40 = vpack.c.bf16 %v505_v37, %v503_v36 }
  0x92   :  { %v827_v53 = vpack.c.bf16 %v482_v45, %v480_v44  ;;  %v510_v39 = vld [vmem:[#allocation8 + $0x1b8] sm:$0xff]  ;;  %v509_v44 = vld [vmem:[#allocation8 + $0x1b0] sm:$0xff]  ;;  %v512_v45 = vld [vmem:[#allocation8 + $0x1c8] sm:$0xff] }
  0x93   :  { %v855_v41 = vpack.c.bf16 %v510_v39, %v508_v38 }
  0x94   :  { %778 = vmatpush1.bf16.msra.mxu0 %v777_v55  ;;  %v481_v55 = vld [vmem:[#allocation8 + $0xd0] sm:$0xff]  ;;  %826 = vmatpush1.bf16.msra.mxu1 %v825_v52  ;;  %v861_v52 = vpack.c.bf16 %v513_v51, %v511_v50 }
  0x95   :  { %780 = vmatprep.subr.bf16.mxu0 %v779_v60  ;;  %v486_v60 = vld [vmem:[#allocation8 + $0xf8] sm:$0xff]  ;;  %v829_v1 = vpack.c.bf16 %v481_v55, %v479_v54  ;;  %828 = vmatprep.subr.bf16.mxu1 %v827_v53  ;;  %v516_v53 = vld [vmem:[#allocation8 + $0x1e8] sm:$0xff] }
  0x96   :  { %v831_v4 = vpack.c.bf16 %v486_v60, %v484_v58  ;;  %v518_v54 = vld [vmem:[#allocation8 + $0x1f8] sm:$0xff]  ;;  %v517_v58 = vld [vmem:[#allocation8 + $0x1f0] sm:$0xff] }
  0x97   :  { %v863_v55 = vpack.c.bf16 %v518_v54, %v516_v53 }
  0x98   :  { %782 = vmatpush1.bf16.msra.mxu0 %v781_v7  ;;  %v801_v7 = vpack.c.bf16 %v353_v63, %v351_v62  ;;  %830 = vmatpush1.bf16.msra.mxu1 %v829_v1  ;;  %v439_v63 = vld [vmem:[%s1174_s4] sm:$0x3] }
  0x99   :  { %784 = vmatprep.subr.bf16.mxu0 %v783_v10  ;;  %v833_v10 = vpack.c.bf16 %v485_v6, %v483_v5  ;;  %832 = vmatprep.subr.bf16.mxu1 %v831_v4  ;;  %v444_v1 = vrot.slane %v439_v63, %v1131_v2  ;;  %v448_v4 = vrot.slane %v439_v63, %v1114_v56 }
  0x9c   :  { %786 = vmatpush1.bf16.msra.mxu0 %v785_v18  ;;  %834 = vmatpush1.bf16.msra.mxu1 %v833_v10  ;;  %v491_v18 = vld [vmem:[#allocation8 + $0x120] sm:$0xff] }
  0x9d   :  { %788 = vmatprep.subr.bf16.mxu0 %v787_v21  ;;  %836 = vmatprep.subr.bf16.mxu1 %v835_v12  ;;  %v498_v21 = vld [vmem:[#allocation8 + $0x158] sm:$0xff]  ;;  %v841_v22 = vpack.c.bf16 %v493_v19, %v491_v18 }
  0x9e   :  { %v843_v23 = vpack.c.bf16 %v498_v21, %v496_v20  ;;  %v519_v12 = vld [vmem:[%s1176_s6] sm:$0x3]  ;;  %s1016_s6 = smov [#allocation10]  }
  0x9f   :  { %v524_v13 = vrot.slane %v519_v12, %v1131_v2  ;;  %v528_v14 = vrot.slane %v519_v12, %v1114_v56 }
  0xa0   :  { %790 = vmatpush1.bf16.msra.mxu0 %v789_v30  ;;  %838 = vmatpush1.bf16.msra.mxu1 %v837_v16  ;;  %v499_v30 = vld [vmem:[#allocation8 + $0x160] sm:$0xff] }
  0xa1   :  { %792 = vmatprep.subr.bf16.mxu0 %v791_v33  ;;  %840 = vmatprep.subr.bf16.mxu1 %v839_v17  ;;  %v506_v33 = vld [vmem:[#allocation8 + $0x198] sm:$0xff]  ;;  %v849_v34 = vpack.c.bf16 %v501_v31, %v499_v30 }
  0xa2   :  { %v851_v35 = vpack.c.bf16 %v506_v33, %v504_v32 }
  0xa4   :  { %794 = vmatpush1.bf16.msra.mxu0 %v793_v43  ;;  %842 = vmatpush1.bf16.msra.mxu1 %v841_v22  ;;  %v507_v43 = vld [vmem:[#allocation8 + $0x1a0] sm:$0xff]  ;;  %v614_v22 = vld [vmem:[%s1177_s7] sm:$0x3]  ;;  %s662_s7 = sshll.u32 %s1016_s6, 4  ;;  %s663_s7 = int_to_ptr.vmem [resolvable:$true] %s662_s7 }
  0xa5   :  { %796 = vmatprep.subr.bf16.mxu0 %v795_v46  ;;  %844 = vmatprep.subr.bf16.mxu1 %v843_v23  ;;  %v514_v46 = vld [vmem:[#allocation8 + $0x1d8] sm:$0xff]  ;;  %v857_v47 = vpack.c.bf16 %v509_v44, %v507_v43  ;;  %v619_v25 = vrot.slane %v614_v22, %v1131_v2  ;;  %v623_v26 = vrot.slane %v614_v22, %v1114_v56  ;;  %s976_s15 = scalar_lea.vmem %s663_s7, 32  ;;  %p981_p5 = scmp.lt.s32.totalorder %s663_s7, %s663_s7 }
  0xa6   :  { %v859_v48 = vpack.c.bf16 %v514_v46, %v512_v45  ;;  %p977_p4 = scmp.ne.s32.totalorder %s663_s7, %s976_s15  ;;  %p982_p6 = scmp.lt.s32.totalorder %s976_s15, %s976_s15 }
  0xa8   :  { %798 = vmatpush1.bf16.msra.mxu0 %v797_v57  ;;  %846 = vmatpush1.bf16.msra.mxu1 %v845_v28  ;;  %v515_v57 = vld [vmem:[#allocation8 + $0x1e0] sm:$0xff]  ;;  %v636_v28 = vunpack.c.l.s4 %v1015_v27  ;;  %p983_p7 = por %p982_p6, %p981_p5 }
  0xa9   :  { %800 = vmatprep.subr.bf16.mxu0 %v799_v61  ;;  %848 = vmatprep.subr.bf16.mxu1 %v847_v29  ;;  %v865_v60 = vpack.c.bf16 %v517_v58, %v515_v57 }
  0xaa   :  { %v637_v31 = vunpack.c.0.s8 %v636_v28  ;;  %p984_p8 = pnand %p983_p7, %p977_p4 }
  0xac   :  { %802 = vmatpush1.bf16.msra.mxu0 %v801_v7  ;;  %850 = vmatpush1.bf16.msra.mxu1 %v849_v34  ;;  %v640_v38 = vsub.s32 %v637_v31, %v1111_v49 }
  0xad   :  { %852 = vmatprep.subr.bf16.mxu1 %v851_v35 }
  0xaf   :  { %431 = vmatmul.mubr.f32.vlgmr.msra.gmra.mrb[0].mxu0 %v1135_v11 }
  0xb0   :  { %854 = vmatpush1.bf16.msra.mxu1 %v853_v40 }
  0xb1   :  { %856 = vmatprep.subr.bf16.mxu1 %v855_v41 }
  0xb4   :  { %858 = vmatpush1.bf16.msra.mxu1 %v857_v47 }
  0xb5   :  { %860 = vmatprep.subr.bf16.mxu1 %v859_v48 }
  0xb8   :  { %862 = vmatpush1.bf16.msra.mxu1 %v861_v52 }
  0xb9   :  { %864 = vmatprep.subr.bf16.mxu1 %v863_v55 }
  0xbc   :  { %866 = vmatpush1.bf16.msra.mxu1 %v865_v60 }
 0x152   :  { %v286_v61 = vpop.f32.mrb[0].mxu1 }
 0x153   :  { %v288_v62 = vpop.f32.mrb[1].mxu1  ;;  %v626_v29 = vadd.f32 %v619_v25, %v286_v61 }
 0x154   :  { %v627_v30 = vadd.f32 %v623_v26, %v288_v62 }
 0x155   :  { %v628_v32 = vsub.f32 %v626_v29, %v1135_v11 }
 0x156   :  { %v629_v34 = vsub.f32 %v627_v30, %v1125_v3 }
 0x182   :  { %v432_v5 = vpop.f32.mrb[0].mxu0 }
 0x183   :  { %v451_v6 = vadd.f32 %v444_v1, %v432_v5  ;;  %v434_v7 = vpop.f32.mrb[1].mxu0 }
 0x184   :  { %v452_v8 = vadd.f32 %v448_v4, %v434_v7 }
 0x185   :  { %v453_v10 = vmax.f32 %v451_v6, 0.0 }
 0x186   :  { %v454_v9 = vmax.f32 %v452_v8, 0.0 }
 0x188   :  { %595 = vmatprep.mubr.f32.mxu1 %v454_v9 }
 0x189   :  { %596 = vmatmul.mubr.f32.vlgmr.msra.gmra.mrb[2].mxu1 %v453_v10 }
 0x25c   :  { %v597_v59 = vpop.f32.mrb[2].mxu1 }
 0x25d   :  { %v598_v15 = vadd.f32 %v597_v59, %v524_v13  ;;  %v599_v16 = vpop.f32.mrb[3].mxu1 }
 0x25e   :  { %v600_v17 = vadd.f32 %v599_v16, %v528_v14 }
 0x25f   :  { %v673_v18 = vmul.f32 -1.442695, %v598_v15 }
 0x260   :  { %v674_v19 = vmul.f32 -1.442695, %v600_v17 }
 0x261   :  { %880 = vpow2.f32 %v673_v18 }
 0x262   :  { %882 = vpow2.f32 %v674_v19 }
 0x26b   :  { %v881_v20 = vpop.eup %880 }
 0x26c   :  { %v883_v21 = vpop.eup %882  ;;  %v608_v23 = vadd.f32 1.0, %v881_v20 }
 0x26d   :  { %v609_v24 = vadd.f32 1.0, %v883_v21 }
 0x26e   :  { %884 = vrcp.f32 %v608_v23 }
 0x26f   :  { %886 = vrcp.f32 %v609_v24 }
 0x278   :  { %v885_v33 = vpop.eup %884 }
 0x279   :  { %v887_v35 = vpop.eup %886  ;;  %v630_v36 = vmul.f32 %v885_v33, %v628_v32 }
 0x27a   :  { %v631_v37 = vmul.f32 %v887_v35, %v629_v34 }
 0x27c   :  { %v634_v39 = vcombine.low %v630_v36, %v631_v37 }
 0x27e   :  { %v641_v2 = vrot.slane %v634_v39, %v640_v38 }
 0x280   :  { %v648_v56 = vrot.slane %v641_v2, %v640_v38 }
 0x282   :  { %v650_v40 = vadd.f32 %v648_v56, %v1121_v0 }
 0x284   :  { %655 = vst.msk [vmem:[#allocation10] sm:$0x3] %vm653_vm0, %v650_v40 }
 0x285   :  { %987 = shalt.err (!%p984_p8)
}
 0x286   :  { %s988_s18 = scalar_lea.hbm %s1178_s8, 32 }
 0x287   :  { %p989_p9 = scmp.ne.s32.totalorder %s1178_s8, %s988_s18  ;;  %p992_p10 = scmp.lt.u32.totalorder %s988_s18, %s1178_s8 }
 0x289   :  { %p994_p11 = pnand %p992_p10, %p989_p9 }
 0x28b   :  { %997 = shalt.err (!%p994_p11)
}
 0x28c   :  { %665 = dma.vmem_to_hbm [thread:$0]  %s663_s7, 32, %s1178_s8, [#allocation4]  }
 0x28d   :  { %1004 = dma.done.wait [#allocation4], 32  }
 0x28e   :  { %1005 = vsyncadd [#allocation4], 4294967264 }
 0x28f   :  { %669 = vsyncpa [#allocation3], 1 }
 0x290   :  { %670 = vsyncpa [#allocation6], 1 }
 0x291   :  { %671 = vsyncpa [#allocation9], 1 }
 0x292   :  { %672 = vsyncpa [#allocation4], 1 }

</bundles_post_ra>
